<compile_context>
chip_gen: v7x
topology: tpu7x:2x2x1
jax: 0.10.0
libtpu: 0.0.40
codegen_flags: <defaults>
</compile_context>

<pallas_src>
import functools

import jax
import jax.numpy as jnp
from jax.experimental import pallas as pl
from jax.experimental.pallas import tpu as pltpu


# ---------------------------------------------------------------------------
# helpers
# ---------------------------------------------------------------------------
def _round_up(x, m):
    return -(-x // m) * m


def _sublane_tile(dtype):
    # second-to-last tile dim: 8 for 32-bit, 16 for 16-bit, 32 for 8-bit dtypes
    return {4: 8, 2: 16, 1: 32}.get(jnp.dtype(dtype).itemsize, 8)


def _vmem_capacity_bytes():
    try:
        return int(pltpu.get_tpu_info().vmem_capacity_bytes)
    except Exception:
        return 64 << 20  # conservative fallback: smallest generation (v7x)


def _pick_tile(full, n_batch, unit, per_unit_bytes, budget, min_steps=4):
    """Pick a tile along an axis of extent `full`.

    Candidates are multiples of `unit` dividing `full` (plus `full` itself,
    always a legal full-extent block).  Among candidates whose double-buffered
    footprint (`tile * per_unit_bytes`) fits `budget`, prefer the largest one
    that still yields >= `min_steps` total grid steps (v7x has 2 TensorCores
    sharded over the parallel grid axes); otherwise take the largest fitting.
    """
    cands = sorted({t for t in range(unit, full + 1, unit) if full % t == 0}
                   | {full})
    fitting = [t for t in cands if t * per_unit_bytes <= budget] or [cands[0]]
    good = [t for t in fitting if n_batch * (full // t) >= min_steps]
    return max(good) if good else max(fitting)


# ---------------------------------------------------------------------------
# kernels
# ---------------------------------------------------------------------------
def _concat_blocks_kernel(*refs):
    """refs = (x1_ref, ..., xk_ref, o_ref).

    Copies each input block into its channel slice (axis 1) of the output
    block.  Works for both the 4D (1, Ci, TH, W) and 3D (1, Ci, TS) blockings.
    Channel offsets that are not sublane-tile aligned fall back to masked
    sublane stores (correct, slightly slower); aligned channel counts store
    fully unmasked.
    """
    o_ref = refs[-1]
    off = 0
    for r in refs[:-1]:
        c = r.shape[1]
        o_ref[:, off:off + c] = r[...]
        off += c


def _concat_dma_kernel(*refs):
    """refs = (x1_hbm, ..., xk_hbm, o_hbm, sem).  Pure HBM->HBM concat.

    One rectangular DMA per input: src is fully contiguous, dst is the
    per-batch contiguous channel slab (strided over batch) - a plain strided
    copy for the DMA engine.  All k copies are started before any wait so they
    run concurrently.
    """
    *in_refs, o_ref, sem = refs
    copies = []
    off = 0
    for i, r in enumerate(in_refs):
        c = r.shape[1]
        cp = pltpu.make_async_copy(r, o_ref.at[:, off:off + c], sem.at[i])
        cp.start()
        copies.append(cp)
        off += c
    for cp in copies:
        cp.wait()


# ---------------------------------------------------------------------------
# wrapper: CorrespondenceMapBase.forward
# ---------------------------------------------------------------------------
def correspondence_map(x1, x2=None, x3=None, *, method="dma"):
    """Concatenate the non-None inputs along the channel dim (NCHW, axis=1)."""
    parts = [x for x in (x1, x2, x3) if x is not None]
    if len(parts) == 1:
        return x1  # PyTorch module returns x1 unchanged

    N, _, H, W = x1.shape
    dtype = x1.dtype
    for p in parts:
        assert p.ndim == 4 and p.shape[0] == N and p.shape[2:] == (H, W), \
            "all inputs must share batch and spatial dims"
        assert p.dtype == dtype, "all inputs must share dtype"

    chans = [int(p.shape[1]) for p in parts]
    c_tot = sum(chans)
    itemsize = jnp.dtype(dtype).itemsize
    # Advisory cost: pure data movement (read each input once, write output once).
    cost = pl.CostEstimate(flops=0, transcendentals=0,
                           bytes_accessed=2 * N * c_tot * H * W * itemsize)

    if method == "dma":
        return pl.pallas_call(
            _concat_dma_kernel,
            out_shape=jax.ShapeDtypeStruct((N, c_tot, H, W), dtype),
            in_specs=[pl.BlockSpec(memory_space=pl.ANY)] * len(parts),
            out_specs=pl.BlockSpec(memory_space=pl.ANY),
            scratch_shapes=[pltpu.SemaphoreType.DMA((len(parts),))],
            cost_estimate=cost,
        )(*parts)

    assert method == "blocks", f"unknown method: {method}"
    sub = _sublane_tile(dtype)
    cap = _vmem_capacity_bytes()
    budget = cap // 4       # double-buffered working set <= 1/4 of physical VMEM
    vmem_limit = cap // 2   # raise the scoped limit well past the working set

    if W % 128 == 0:
        # 4D NCHW path: W already lane-dense, channel outside the minor dims.
        # Bytes per TH-row, including both directions and 2x double buffering.
        per_th = 2 * (sum(chans) + c_tot) * W * itemsize
        TH = _pick_tile(H, N, sub, per_th, budget)
        grid = (N, H // TH)
        in_specs = [pl.BlockSpec((1, c, TH, W), lambda n, h: (n, 0, h, 0))
                    for c in chans]
        out_spec = pl.BlockSpec((1, c_tot, TH, W), lambda n, h: (n, 0, h, 0))
        out_shape = jax.ShapeDtypeStruct((N, c_tot, H, W), dtype)
        call_parts = parts
        reshape_back = None
    else:
        # Lane-dense 3D path: merge H,W (contiguous -> free reshape) so the
        # lane dim is a multiple of 128.  Channel becomes the sublane dim; its
        # VMEM footprint is padded to the dtype's sublane tile.
        S = H * W
        per_lane = 2 * (sum(_round_up(c, sub) for c in chans)
                        + _round_up(c_tot, sub)) * itemsize
        TS = _pick_tile(S, N, 128, per_lane, budget)
        grid = (N, S // TS)
        in_specs = [pl.BlockSpec((1, c, TS), lambda n, s: (n, 0, s))
                    for c in chans]
        out_spec = pl.BlockSpec((1, c_tot, TS), lambda n, s: (n, 0, s))
        out_shape = jax.ShapeDtypeStruct((N, c_tot, S), dtype)
        call_parts = [p.reshape(N, c, S) for p, c in zip(parts, chans)]
        reshape_back = (N, c_tot, H, W)

    out = pl.pallas_call(
        _concat_blocks_kernel,
        out_shape=out_shape,
        grid=grid,
        in_specs=in_specs,
        out_specs=out_spec,
        compiler_params=pltpu.CompilerParams(
            dimension_semantics=("parallel", "parallel"),
            vmem_limit_bytes=vmem_limit),
        cost_estimate=cost,
    )(*call_parts)
    return out.reshape(reshape_back) if reshape_back is not None else out


# ---------------------------------------------------------------------------
if __name__ == "__main__":
    key = jax.random.PRNGKey(0)
    k1, k2, k3, k4, k5, k6, k7 = jax.random.split(key, 7)

    blocks = jax.jit(functools.partial(correspondence_map, method="blocks"))
    dma = jax.jit(functools.partial(correspondence_map, method="dma"))

    # --- small feature maps (W % 128 != 0 -> lane-dense reshaped path) ------
    N, H, W = 2, 16, 16
    C1, C2, C3 = 4, 8, 4
    x1 = jax.random.normal(k1, (N, C1, H, W), jnp.float32)
    x2 = jax.random.normal(k2, (N, C2, H, W), jnp.float32)
    x3 = jax.random.normal(k3, (N, C3, H, W), jnp.float32)

    ref123 = jnp.concatenate([x1, x2, x3], axis=1)
    out123 = jax.block_until_ready(blocks(x1, x2, x3))
    assert out123.shape == (N, C1 + C2 + C3, H, W), out123.shape
    assert bool(jnp.array_equal(out123, ref123))

    out123_dma = jax.block_until_ready(dma(x1, x2, x3))
    assert bool(jnp.array_equal(out123_dma, ref123))

    ref12 = jnp.concatenate([x1, x2], axis=1)
    out12 = jax.block_until_ready(blocks(x1, x2))
    assert bool(jnp.array_equal(out12, ref12))

    ref13 = jnp.concatenate([x1, x3], axis=1)
    out13 = jax.block_until_ready(blocks(x1, None, x3))
    assert bool(jnp.array_equal(out13, ref13))
    out13_dma = jax.block_until_ready(dma(x1, None, x3))
    assert bool(jnp.array_equal(out13_dma, ref13))

    # --- x1 only: module returns it unchanged -------------------------------
    out1 = jax.block_until_ready(blocks(x1))
    assert bool(jnp.array_equal(out1, x1))

    # --- lane-aligned feature maps (W % 128 == 0 -> 4D NCHW path) -----------
    y1 = jax.random.normal(k4, (1, 4, 8, 128), jnp.float32)
    y2 = jax.random.normal(k5, (1, 8, 8, 128), jnp.float32)
    outy = jax.block_until_ready(blocks(y1, y2))
    assert bool(jnp.array_equal(outy, jnp.concatenate([y1, y2], axis=1)))
    outy_dma = jax.block_until_ready(dma(y1, y2))
    assert bool(jnp.array_equal(outy_dma, jnp.concatenate([y1, y2], axis=1)))

    # --- bf16 (dtype-aware sublane tiling, odd W) ----------------------------
    z1 = jax.random.normal(k6, (2, 16, 16, 24), jnp.float32).astype(jnp.bfloat16)
    z2 = jax.random.normal(k7, (2, 16, 16, 24), jnp.float32).astype(jnp.bfloat16)
    outz = jax.block_until_ready(blocks(z1, z2))
    assert bool(jnp.array_equal(outz, jnp.concatenate([z1, z2], axis=1)))

    print("KERNEL_OK")
</pallas_src>

<mosaic_0001>
module attributes {stable_mosaic.version = 11 : i64} {
  func.func @_concat_blocks_kernel(%arg0: i32, %arg1: i32, %arg2: memref<1x4x128xf32, #tpu.memory_space<vmem>>, %arg3: memref<1x8x128xf32, #tpu.memory_space<vmem>>, %arg4: memref<1x4x128xf32, #tpu.memory_space<vmem>>, %arg5: memref<1x16x128xf32, #tpu.memory_space<vmem>>) attributes {dimension_semantics = [#tpu.dimension_semantics<parallel>, #tpu.dimension_semantics<parallel>], iteration_bounds = array<i64: 2, 2>, scalar_prefetch = 0 : i64, scratch_operands = 0 : i64, tpu.core_type = #tpu.core_type<tc>, window_params = [{transform_indices = @transform_0, window_bounds = array<i64: 1, 4, 128>}, {transform_indices = @transform_1, window_bounds = array<i64: 1, 8, 128>}, {transform_indices = @transform_2, window_bounds = array<i64: 1, 4, 128>}, {transform_indices = @transform_3, window_bounds = array<i64: 1, 16, 128>}]} {
    %c0 = arith.constant 0 : index
    %c0_0 = arith.constant 0 : index
    %c0_1 = arith.constant 0 : index
    %0 = vector.load %arg2[%c0, %c0_0, %c0_1] : memref<1x4x128xf32, #tpu.memory_space<vmem>>, vector<1x4x128xf32>
    %c0_2 = arith.constant 0 : index
    %c0_3 = arith.constant 0 : index
    %c0_4 = arith.constant 0 : index
    %1 = vector.load %arg5[%c0_2, %c0_3, %c0_4] : memref<1x16x128xf32, #tpu.memory_space<vmem>>, vector<1x4x128xf32>
    tpu.vector_store %arg5[%c0_2, %c0_3, %c0_4], %0 {strides = array<i32>} : memref<1x16x128xf32, #tpu.memory_space<vmem>>, vector<1x4x128xf32>,
    %c0_5 = arith.constant 0 : index
    %c0_6 = arith.constant 0 : index
    %c0_7 = arith.constant 0 : index
    %2 = vector.load %arg3[%c0_5, %c0_6, %c0_7] : memref<1x8x128xf32, #tpu.memory_space<vmem>>, vector<1x8x128xf32>
    %c0_8 = arith.constant 0 : index
    %c4 = arith.constant 4 : index
    %c0_9 = arith.constant 0 : index
    %3 = vector.load %arg5[%c0_8, %c4, %c0_9] : memref<1x16x128xf32, #tpu.memory_space<vmem>>, vector<1x8x128xf32>
    tpu.vector_store %arg5[%c0_8, %c4, %c0_9], %2 {strides = array<i32>} : memref<1x16x128xf32, #tpu.memory_space<vmem>>, vector<1x8x128xf32>,
    %c0_10 = arith.constant 0 : index
    %c0_11 = arith.constant 0 : index
    %c0_12 = arith.constant 0 : index
    %4 = vector.load %arg4[%c0_10, %c0_11, %c0_12] : memref<1x4x128xf32, #tpu.memory_space<vmem>>, vector<1x4x128xf32>
    %c0_13 = arith.constant 0 : index
    %c12 = arith.constant 12 : index
    %c0_14 = arith.constant 0 : index
    %5 = vector.load %arg5[%c0_13, %c12, %c0_14] : memref<1x16x128xf32, #tpu.memory_space<vmem>>, vector<1x4x128xf32>
    tpu.vector_store %arg5[%c0_13, %c12, %c0_14], %4 {strides = array<i32>} : memref<1x16x128xf32, #tpu.memory_space<vmem>>, vector<1x4x128xf32>,
    return
  }
  func.func @transform_0(%arg0: i32, %arg1: i32) -> (i32, i32, i32) {
    %c0_i32 = arith.constant 0 : i32
    %c0_i32_0 = arith.constant 0 : i32
    return %arg0, %c0_i32, %arg1 : i32, i32, i32
  }
  func.func @transform_1(%arg0: i32, %arg1: i32) -> (i32, i32, i32) {
    %c0_i32 = arith.constant 0 : i32
    %c0_i32_0 = arith.constant 0 : i32
    return %arg0, %c0_i32, %arg1 : i32, i32, i32
  }
  func.func @transform_2(%arg0: i32, %arg1: i32) -> (i32, i32, i32) {
    %c0_i32 = arith.constant 0 : i32
    %c0_i32_0 = arith.constant 0 : i32
    return %arg0, %c0_i32, %arg1 : i32, i32, i32
  }
  func.func @transform_3(%arg0: i32, %arg1: i32) -> (i32, i32, i32) {
    %c0_i32 = arith.constant 0 : i32
    %c0_i32_0 = arith.constant 0 : i32
    return %arg0, %c0_i32, %arg1 : i32, i32, i32
  }
}

</mosaic_0001>

<bundles_post_ra>
// kernel: correspondence_map.1
= control target key start
LH: loop header
LB: loop body
LE: loop exit
PB: predicated region body
PF: predicated region fallthrough
CT: control target
= control target key end

     0   :  { %s560_s12 = smov 0   ;;  %s562_s13 = smov 0   ;;  %s661_s0 = inlined_call_operand.vmem [shape: f32[2,4,256], index: 0, kind: input, shape index: {}]   ;;  %s662_s1 = inlined_call_operand.vmem [shape: f32[2,8,256], index: 1, kind: input, shape index: {}]   ;;  %s663_s2 = inlined_call_operand.vmem [shape: f32[2,4,256], index: 2, kind: input, shape index: {}]   ;;  %s664_s3 = inlined_call_operand.vmem [shape: f32[2,16,256], index: 3, kind: output, shape index: {}]  }
   0x1   :  { %s564_s14 = smov 0   ;;  %s566_s15 = smov 0  }
   0x2   :  { %s568_s16 = smov 0   ;;  %s570_s17 = smov 0  }
   0x3   :  { %s572_s18 = smov 0  }
   0x4 LB: > { %s22_s19 = sadd.s32 1, %s530_s16  ;;  %s25_s20 = sadd.s32 1, %s534_s17  ;;  %s538_s18 = sphi %s572_s18, %s13_s18   ;;  %s534_s17 = sphi %s570_s17, %s671_s17   ;;  %s530_s16 = sphi %s568_s16, %s670_s16   ;;  %s526_s15 = sphi %s566_s15, %s669_s15   ;;  %s522_s14 = sphi %s564_s14, %s668_s14   ;;  %s518_s13 = sphi %s562_s13, %s667_s13   ;;  %s514_s12 = sphi %s560_s12, %s666_s12  }
   0x5   : > { %p23_p0 = scmp.ge.s32.totalorder %s22_s19, 2  ;;  %s411_s21 = sadd.s32 4294967295, %s538_s18  }
   0x6   : > { %p128_p1 = scmp.ne.s32.totalorder %s518_s13, %s514_s12  ;;  %p129_p2 = scmp.eq.s32.totalorder %s411_s21, 3 }
   0x7   : > { %s673_s19 = smov (%p23_p0, %s22_s19), 0  ;;  %s675_s20 = smov (!%p23_p0, %s25_s20), %s534_s17 }
   0x8   : > { %s114_s22 = ssub.s32 %s530_s16, %s673_s19  ;;  %p27_p3 = scmp.ge.s32.totalorder %s675_s20, 2 }
   0x9   : > { %p415_p4 = scmp.ge.s32.totalorder %s538_s18, 1  ;;  %p606_p5 = por %p129_p2, %p128_p1 }
   0xa   : > { %p186_p6 = scmp.lt.s32.totalorder %s538_s18, 5  ;;  %s677_s20 = smov (%p27_p3, %s675_s20), 0 }
   0xb   : > { %s113_s24 = ssub.s32 %s534_s17, %s677_s20  ;;  %s118_s26 = sadd.s32 1, %s518_s13 }
   0xc   : > { %p187_p7 = pnand %p415_p4, %p186_p6  ;;  %s115_s25 = sor.u32 %s114_s22, %s113_s24 }
   0xd   : > { %p116_p8 = scmp.eq.s32.totalorder %s115_s25, 0  ;;  %s225_s28 = sand.u32 (!%p187_p7), 1, %s514_s12  }
   0xe   : > { %190 = sbr.rel (%p187_p7) target bundleno = 39 (0x27), region = 32  ;;  %p228_p9 = scmp.lt.s32.totalorder (!%p187_p7), %s526_s15, 1 }
   0xf   : > { %s617_s27 = scalar_select %p116_p8, %s518_s13, %s118_s26  }
  0x10   : > { %p230_p10 = scmp.lt.s32.totalorder (!%p187_p7), %s522_s14, 1  ;;  %s416_s29 = sshll.u32 (!%p187_p7), %s225_s28, 4 }
  0x11   : > { %s227_s28 = scalar_lea.vmem (!%p187_p7), [#allocation2], %s416_s29 }
  0x15   : > { %s229_s30 = scalar_select %p228_p9, %s526_s15, 1 }
  0x16   : > { %s231_s4 = scalar_select %p230_p10, %s522_s14, 1 }
  0x17   : > { %s417_s5 = sshll.u32 %s229_s30, 1  ;;  %s424_s30 = sshll.u32 (%p606_p5), %s526_s15, 2 }
  0x18   : > { %s233_s6 = sadd.s32 %s417_s5, %s231_s4  ;;  %264 = sbr.rel (!%p606_p5) target bundleno = 39 (0x27), region = 36 }
  0x19   : > { %s418_s7 = sshll.u32 %s233_s6, 2  ;;  %s420_s8 = sshll.u32 %s233_s6, 3 }
  0x1a   : > { %s235_s11 = scalar_lea.vmem %s661_s0, %s418_s7  ;;  %s243_s24 = scalar_lea.vmem %s662_s1, %s420_s8 }
  0x1b   : > { %v252_v0 = vld [vmem:[%s235_s11] sm:$0xf]  ;;  %s251_s26 = scalar_lea.vmem %s663_s2, %s418_s7  ;;  %s266_s4 = sadd.s32 (%p606_p5), %s522_s14, %s424_s30 }
  0x1c   : > { %v254_v1 = vld [vmem:[%s243_s24] sm:$0xff]  ;;  %253 = vst [vmem:[%s227_s28] sm:$0xf] %v252_v0  ;;  %s425_s5 = sshll.u32 (%p606_p5), %s266_s4, 3 }
  0x1d   : > { %255 = vst [vmem:[%s227_s28 + $0x4] sm:$0xff] %v254_v1  ;;  %v256_v2 = vld [vmem:[%s251_s26] sm:$0xf]  ;;  %s268_s9 = scalar_lea.vmem (%p606_p5), %s664_s3, %s425_s5 }
  0x1e   : > { %257 = vst [vmem:[%s227_s28 + $0xc] sm:$0xf] %v256_v2 }
  0x24   : > { %v298_v3 = vld [vmem:[%s227_s28] sm:$0xff] }
  0x25   : > { %v300_v4 = vld [vmem:[%s227_s28 + $0x8] sm:$0xff]  ;;  %299 = vst [vmem:[%s268_s9] sm:$0xff] %v298_v3 }
  0x26   : > { %301 = vst [vmem:[%s268_s9 + $0x10] sm:$0xff] %v300_v4 }
  0x27 PF: > { %s13_s18 = sadd.s32 1, %s538_s18   ;;  %s666_s12 = smov %s518_s13 }
  0x28   : > { %p10_p11 = scmp.ge.s32.totalorder %s13_s18, 6   ;;  %s667_s13 = smov %s617_s27 }
  0x29   : > { %s668_s14 = smov %s530_s16  ;;  %s669_s15 = smov %s534_s17 }
  0x2a   : > { %s670_s16 = smov %s673_s19  ;;  %s671_s17 = smov %s677_s20 }
  0x2b   :  { %12 = sbr.rel (!%p10_p11) target bundleno = 4 (0x4), region = 106 }

</bundles_post_ra>
